<compile_context>
chip_gen: v7x
topology: tpu7x:2x2x1
jax: 0.10.0
libtpu: 0.0.40
codegen_flags: <defaults>
</compile_context>

<pallas_src>
import jax
import jax.numpy as jnp
from jax import lax
from jax.experimental import pallas as pl
from jax.experimental.pallas import tpu as pltpu


# ------------------------------ small helpers -------------------------------

_CompilerParamsCls = getattr(pltpu, "CompilerParams", None) or getattr(
    pltpu, "TPUCompilerParams", None)


def _mosaic_params():
    if _CompilerParamsCls is None:
        return None
    return _CompilerParamsCls(dimension_semantics=("parallel",))


def _round_up(x, m):
    return ((x + m - 1) // m) * m


def _pad_rows(x, rows):
    if x.shape[0] == rows:
        return x
    pad = [(0, rows - x.shape[0])] + [(0, 0)] * (x.ndim - 1)
    return jnp.pad(x, pad)


def _choose_tile_rows(batch, num_actions, itemsize):
    """Batch-tile size: multiple of 128, a few MiB of VMEM per input stream.

    Keeps double-buffered tiles well under the scoped-VMEM default on every
    generation (v5e 16 MiB scoped, v6e 32 MiB scoped, v7x 64 MiB physical).
    """
    budget = 2 * 1024 * 1024                      # bytes per single input tile
    tb = budget // max(1, num_actions * itemsize)
    tb = max(128, min(4096, (tb // 128) * 128))
    return int(min(tb, _round_up(batch, 128)))


# ----------------------------- Pallas kernels ------------------------------

# dot_general dimension numbers for (1, A) . (TB, A)^T -> (1, TB)
_TRANS_B_DIMS = (((1,), (1,)), ((), ()))


def _log_prob_kernel(logits_ref, actions_ref, out_ref):
    """Categorical(logits).log_prob(actions) for one [TB, A] tile.

    logits_ref: [TB, A] (native dtype), actions_ref: [TB, 1] int32,
    out_ref: [1, 1, TB] float32 (lane-dense row of per-row log-probs).
    """
    TB, A = logits_ref.shape
    x = logits_ref[...].astype(jnp.float32)                 # in-register upcast
    m = jnp.max(x, axis=-1, keepdims=True)                  # [TB, 1] row max (XLU)
    e = jnp.exp(x - m)                                      # [TB, A] (EUP)
    col = lax.broadcasted_iota(jnp.int32, (TB, A), 1)
    onehot = (col == actions_ref[...]).astype(jnp.float32)  # [TB, A]
    sel_shift = (x - m) * onehot                            # selected logit - row max
    # Lane-dense row reductions over A via the otherwise-idle MXU:
    # (1, A) . (TB, A)^T -> (1, TB); avoids any (TB,1)->(1,TB) relayout.
    ones_row = jnp.ones((1, A), jnp.float32)
    sel_row = lax.dot_general(ones_row, sel_shift, _TRANS_B_DIMS,
                              preferred_element_type=jnp.float32)
    den_row = lax.dot_general(ones_row, e, _TRANS_B_DIMS,
                              preferred_element_type=jnp.float32)
    # out[b] = x[b, a_b] - logsumexp(x[b, :]).  Out-of-range actions silently
    # yield -logsumexp(x - m) instead of raising (PyTorch Categorical errors).
    out_ref[0] = sel_row - jnp.log(den_row)


def _sample_kernel(logits_ref, unif_ref, out_ref):
    """Categorical(logits).sample() via Gumbel-max for one [TB, A] tile.

    logits_ref: [TB, A] (native dtype), unif_ref: [TB, A] float32 in [0, 1),
    out_ref: [1, 1, TB] int32 (lane-dense row of sampled action indices).
    """
    TB, A = logits_ref.shape
    u = jnp.maximum(unif_ref[...], 1e-12)                   # avoid log(0)
    g = -jnp.log(-jnp.log(u))                               # Gumbel(0, 1) (EUP)
    z = logits_ref[...].astype(jnp.float32) + g             # perturbed logits
    zmax = jnp.max(z, axis=-1, keepdims=True)               # [TB, 1]
    col = lax.broadcasted_iota(jnp.int32, (TB, A), 1)
    # First-index argmax as a column, then exact one-hot of that index.
    idx_col = jnp.min(jnp.where(z == zmax, col, A), axis=-1, keepdims=True)
    onehot = (col == idx_col).astype(jnp.float32)           # exactly one 1 per row
    # Lane-dense row of indices via the MXU: sum_a a * onehot[b, a] (exact in f32).
    wts = lax.broadcasted_iota(jnp.float32, (1, A), 1)
    idx_row = lax.dot_general(wts, onehot, _TRANS_B_DIMS,
                              preferred_element_type=jnp.float32)
    out_ref[0] = idx_row.astype(jnp.int32)


# ------------------------------ Python wrapper ------------------------------

class BaseDiscreteModelPallas:
    """Pallas port of BaseDiscreteModel (no parameters)."""

    def forward(self, inputs):
        # Identity on logits (see TODO(synk) at top of file).
        return inputs

    # ---- distribution ops (Pallas hot paths) ----

    def log_prob(self, observations, actions):
        logits = self.forward(observations)                 # keep native dtype
        B, A = logits.shape
        itemsize = jnp.dtype(logits.dtype).itemsize
        TB = _choose_tile_rows(B, A, itemsize)
        Bp = _round_up(B, TB)
        G = Bp // TB

        logits_p = _pad_rows(logits, Bp)
        actions_p = _pad_rows(actions.astype(jnp.int32).reshape(B, 1), Bp)

        out = pl.pallas_call(
            _log_prob_kernel,
            out_shape=jax.ShapeDtypeStruct((G, 1, TB), jnp.float32),
            grid=(G,),
            in_specs=[
                pl.BlockSpec((TB, A), lambda i: (i, 0)),
                # (TB, 1) int32 block pads to 128 lanes in VMEM (footprint only;
                # DMA moves just TB words) — acceptably small at these tiles.
                pl.BlockSpec((TB, 1), lambda i: (i, 0)),
            ],
            out_specs=pl.BlockSpec((1, 1, TB), lambda i: (i, 0, 0)),
            compiler_params=_mosaic_params(),
        )(logits_p, actions_p)
        return out.reshape(Bp)[:B]

    def sample(self, observation, key=None, seed=0):
        logits = self.forward(observation)                  # keep native dtype
        B, A = logits.shape
        if key is None:
            key = jax.random.PRNGKey(seed)
        itemsize = max(jnp.dtype(logits.dtype).itemsize, 4)
        TB = _choose_tile_rows(B, A, itemsize)
        Bp = _round_up(B, TB)
        G = Bp // TB

        logits_p = _pad_rows(logits, Bp)
        unif = jax.random.uniform(key, (Bp, A), dtype=jnp.float32)

        out = pl.pallas_call(
            _sample_kernel,
            out_shape=jax.ShapeDtypeStruct((G, 1, TB), jnp.int32),
            grid=(G,),
            in_specs=[
                pl.BlockSpec((TB, A), lambda i: (i, 0)),
                pl.BlockSpec((TB, A), lambda i: (i, 0)),
            ],
            out_specs=pl.BlockSpec((1, 1, TB), lambda i: (i, 0, 0)),
            compiler_params=_mosaic_params(),
        )(logits_p, unif)
        return out.reshape(Bp)[:B]

    # ---- identity (un)flatten helpers ----

    def flatten_observation(self, observation):
        return observation

    def flatten_action(self, action):
        return action

    def unflatten_observation(self, observation):
        return observation

    def unflatten_action(self, action):
        return action


# ----------------------------------- main -----------------------------------

if __name__ == "__main__":
    B, A = 8, 32  # batch=8, num_actions=32

    key = jax.random.PRNGKey(0)
    k_obs, k_act, k_tgt, k_sample = jax.random.split(key, 4)

    observations = jax.random.normal(k_obs, (B, A), dtype=jnp.float32)
    actions = jax.random.randint(k_act, (B,), 0, A, dtype=jnp.int32)

    model = BaseDiscreteModelPallas()

    # Pallas log_prob vs pure-JAX reference (f32).
    lp = jax.block_until_ready(model.log_prob(observations, actions))
    ref = jax.nn.log_softmax(observations, axis=-1)[jnp.arange(B), actions]
    assert lp.shape == (B,)
    assert jnp.allclose(lp, ref, atol=1e-5, rtol=1e-5), (lp, ref)

    # Native-dtype (bf16) path: no upcast in the wrapper, cast happens in-kernel.
    obs_bf16 = observations.astype(jnp.bfloat16)
    lp_bf = jax.block_until_ready(model.log_prob(obs_bf16, actions))
    ref_bf = jax.nn.log_softmax(obs_bf16.astype(jnp.float32), axis=-1)[
        jnp.arange(B), actions]
    assert jnp.allclose(lp_bf, ref_bf, atol=1e-4, rtol=1e-4), (lp_bf, ref_bf)

    # Gumbel-max sampling: with strongly peaked logits the sample equals the
    # peak with overwhelming probability; also check per-key determinism.
    targets = jax.random.randint(k_tgt, (B,), 0, A, dtype=jnp.int32)
    peaked = (jax.random.normal(k_obs, (B, A), dtype=jnp.float32)
              + 100.0 * jax.nn.one_hot(targets, A, dtype=jnp.float32))
    s1 = jax.block_until_ready(model.sample(peaked, key=k_sample))
    s2 = jax.block_until_ready(model.sample(peaked, key=k_sample))
    assert s1.shape == (B,)
    assert bool(jnp.all((s1 >= 0) & (s1 < A)))
    assert jnp.array_equal(s1, s2)
    assert jnp.array_equal(s1, targets), (s1, targets)

    # Identity flatten/unflatten round trips.
    assert jnp.array_equal(
        model.unflatten_observation(model.flatten_observation(observations)),
        observations,
    )
    assert jnp.array_equal(
        model.unflatten_action(model.flatten_action(actions)), actions
    )

    print("KERNEL_OK")
</pallas_src>

<mosaic_0001>
module attributes {stable_mosaic.version = 11 : i64} {
  func.func @_log_prob_kernel(%arg0: i32, %arg1: memref<128x32xf32, #tpu.memory_space<vmem>>, %arg2: memref<128x1xi32, #tpu.memory_space<vmem>>, %arg3: memref<1x1x128xf32, #tpu.memory_space<vmem>>) attributes {dimension_semantics = [#tpu.dimension_semantics<parallel>], iteration_bounds = array<i64: 1>, scalar_prefetch = 0 : i64, scratch_operands = 0 : i64, tpu.core_type = #tpu.core_type<tc>, window_params = [{transform_indices = @transform_0, window_bounds = array<i64: 128, 32>}, {transform_indices = @transform_1, window_bounds = array<i64: 128, 1>}, {transform_indices = @transform_2, window_bounds = array<i64: 1, 1, 128>}]} {
    %c0 = arith.constant 0 : index
    %c0_0 = arith.constant 0 : index
    %0 = vector.load %arg1[%c0, %c0_0] : memref<128x32xf32, #tpu.memory_space<vmem>>, vector<128x32xf32>
    %cst = arith.constant dense<0xFF800000> : vector<128xf32>
    %1 = vector.multi_reduction <maximumf>, %0, %cst [1] : vector<128x32xf32> to vector<128xf32>
    %2 = vector.shape_cast %1 : vector<128xf32> to vector<128x1xf32>
    %3 = vector.broadcast %2 : vector<128x1xf32> to vector<128x32xf32>
    %4 = arith.subf %0, %3 : vector<128x32xf32>
    %5 = math.exp %4 : vector<128x32xf32>
    %6 = tpu.iota {dimensions = array<i32: 1>} : vector<128x32xi32>
    %c0_1 = arith.constant 0 : index
    %c0_2 = arith.constant 0 : index
    %7 = vector.load %arg2[%c0_1, %c0_2] : memref<128x1xi32, #tpu.memory_space<vmem>>, vector<128x1xi32>
    %8 = vector.broadcast %7 : vector<128x1xi32> to vector<128x32xi32>
    %9 = arith.cmpi eq, %6, %8 : vector<128x32xi32>
    %10 = arith.extui %9 : vector<128x32xi1> to vector<128x32xi32>
    %11 = arith.sitofp %10 : vector<128x32xi32> to vector<128x32xf32>
    %12 = vector.broadcast %2 : vector<128x1xf32> to vector<128x32xf32>
    %13 = arith.subf %0, %12 : vector<128x32xf32>
    %14 = arith.mulf %13, %11 : vector<128x32xf32>
    %cst_3 = arith.constant 1.000000e+00 : f32
    %15 = vector.broadcast %cst_3 : f32 to vector<1x32xf32>
    %cst_4 = arith.constant dense<0.000000e+00> : vector<1x128xf32>
    %16 = tpu.matmul %15, %14, %cst_4 {dimension_numbers = #tpu.dot_dimension_numbers<[1], [1], [0], [0], [0, 0, 1, 0], [], []>} : vector<1x32xf32>, vector<128x32xf32>, vector<1x128xf32> -> vector<1x128xf32>
    %cst_5 = arith.constant dense<0.000000e+00> : vector<1x128xf32>
    %17 = tpu.matmul %15, %5, %cst_5 {dimension_numbers = #tpu.dot_dimension_numbers<[1], [1], [0], [0], [0, 0, 1, 0], [], []>} : vector<1x32xf32>, vector<128x32xf32>, vector<1x128xf32> -> vector<1x128xf32>
    %18 = math.log %17 : vector<1x128xf32>
    %19 = arith.subf %16, %18 : vector<1x128xf32>
    %c0_6 = arith.constant 0 : index
    %c0_7 = arith.constant 0 : index
    %c0_8 = arith.constant 0 : index
    %20 = vector.load %arg3[%c0_6, %c0_7, %c0_8] : memref<1x1x128xf32, #tpu.memory_space<vmem>>, vector<1x1x128xf32>
    %21 = vector.shape_cast %20 : vector<1x1x128xf32> to vector<1x128xf32>
    %22 = vector.shape_cast %19 : vector<1x128xf32> to vector<1x1x128xf32>
    tpu.vector_store %arg3[%c0_6, %c0_7, %c0_8], %22 {strides = array<i32>} : memref<1x1x128xf32, #tpu.memory_space<vmem>>, vector<1x1x128xf32>,
    return
  }
  func.func @transform_0(%arg0: i32) -> (i32, i32) {
    %c0_i32 = arith.constant 0 : i32
    %c0_i32_0 = arith.constant 0 : i32
    return %arg0, %c0_i32 : i32, i32
  }
  func.func @transform_1(%arg0: i32) -> (i32, i32) {
    %c0_i32 = arith.constant 0 : i32
    %c0_i32_0 = arith.constant 0 : i32
    return %arg0, %c0_i32 : i32, i32
  }
  func.func @transform_2(%arg0: i32) -> (i32, i32, i32) {
    %c0_i32 = arith.constant 0 : i32
    %c0_i32_0 = arith.constant 0 : i32
    %c0_i32_1 = arith.constant 0 : i32
    return %arg0, %c0_i32, %c0_i32_0 : i32, i32, i32
  }
}

</mosaic_0001>

<bundles_post_ra>
// kernel: tpu_custom_call.1
= control target key start
LH: loop header
LB: loop body
LE: loop exit
PB: predicated region body
PF: predicated region fallthrough
CT: control target
= control target key end

     0   :  { %vm28_vm0 = vcmask 261120   ;;  %v796_v6 = vmov 0   ;;  %s1140_s0 = inlined_call_operand.vmem [shape: f32[128,32], index: 0, kind: input, shape index: {}]   ;;  %s1141_s1 = inlined_call_operand.vmem [shape: s32[128,1], index: 1, kind: input, shape index: {}]   ;;  %s1142_s2 = inlined_call_operand.hbm [shape: f32[1,1,128], index: 2, kind: output, shape index: {}]  }
   0x1   :  { %v820_v0 = vld [vmem:[%s1140_s0 + $0x10] sm:$0xff]  ;;  %v825_v1 = vld [vmem:[%s1140_s0] sm:$0xff]  ;;  %v830_v2 = vld [vmem:[%s1140_s0 + $0x18] sm:$0xff]  ;;  %737 = vset.pattern.permute.xlu1 %v796_v6  ;;  %736 = vset.pattern.permute.xlu0 %v796_v6 }
   0x2   :  { %v35_v3 = vsel %vm28_vm0, %v820_v0, -inf  ;;  %v29_v4 = vsel %vm28_vm0, %v825_v1, -inf  ;;  %v839_v5 = vld [vmem:[%s1140_s0 + $0x8] sm:$0xff]  ;;  %v38_v7 = vsel %vm28_vm0, %v830_v2, -inf  ;;  %v853_v10 = vld [vmem:[%s1140_s0 + $0x20] sm:$0xff]  ;;  %v862_v13 = vld [vmem:[%s1140_s0 + $0x38] sm:$0xff] }
   0x3   :  { %36 = vmax.xlane.f32.xlu1 %v35_v3  ;;  %30 = vmax.xlane.f32.xlu0 %v29_v4  ;;  %v32_v8 = vsel %vm28_vm0, %v839_v5, -inf  ;;  %v848_v9 = vld [vmem:[%s1140_s0 + $0x28] sm:$0xff]  ;;  %v41_v12 = vsel %vm28_vm0, %v853_v10, -inf  ;;  %v867_v14 = vld [vmem:[%s1140_s0 + $0x30] sm:$0xff] }
   0x4   :  { %v44_v11 = vsel %vm28_vm0, %v848_v9, -inf }
   0x7   :  { %39 = vmax.xlane.f32.xlu1 %v38_v7  ;;  %33 = vmax.xlane.f32.xlu0 %v32_v8 }
   0xb   :  { %45 = vmax.xlane.f32.xlu1 %v44_v11  ;;  %42 = vmax.xlane.f32.xlu0 %v41_v12 }
   0xc   :  { %7 = vsyncpa [#allocation3], 0  ;;  %v50_v15 = vsel %vm28_vm0, %v862_v13, -inf  ;;  %v47_v16 = vsel %vm28_vm0, %v867_v14, -inf  ;;  %v876_v17 = vld [vmem:[%s1140_s0 + $0x40] sm:$0xff]  ;;  %v881_v18 = vld [vmem:[%s1140_s0 + $0x48] sm:$0xff] }
   0xd   :  { %v53_v19 = vsel %vm28_vm0, %v876_v17, -inf  ;;  %v56_v20 = vsel %vm28_vm0, %v881_v18, -inf  ;;  %v890_v21 = vld [vmem:[%s1140_s0 + $0x50] sm:$0xff]  ;;  %v895_v22 = vld [vmem:[%s1140_s0 + $0x58] sm:$0xff]  ;;  %v904_v25 = vld [vmem:[%s1140_s0 + $0x68] sm:$0xff]  ;;  %v797_v27 = vmov 0.0|0.0  }
   0xe   :  { %v59_v23 = vsel %vm28_vm0, %v890_v21, -inf  ;;  %v62_v24 = vsel %vm28_vm0, %v895_v22, -inf  ;;  %v68_v26 = vsel %vm28_vm0, %v904_v25, -inf  ;;  %698 = vmatprep.subr.bf16.mxu1 %v797_v27  ;;  %666 = vmatprep.subr.bf16.mxu0 %v797_v27  ;;  %v128_v28 = vld [vmem:[%s1141_s1 + $0x8] sm:$0xff]  ;;  %v127_v29 = vld [vmem:[%s1141_s1] sm:$0xff]  ;;  %v129_v30 = vld [vmem:[%s1141_s1 + $0x10] sm:$0xff] }
   0xf   :  { %51 = vmax.xlane.f32.xlu1 %v50_v15  ;;  %48 = vmax.xlane.f32.xlu0 %v47_v16  ;;  %v131_v31 = vld [vmem:[%s1141_s1 + $0x20] sm:$0xff]  ;;  %v130_v32 = vld [vmem:[%s1141_s1 + $0x18] sm:$0xff]  ;;  %v132_v33 = vld [vmem:[%s1141_s1 + $0x28] sm:$0xff]  ;;  %vm798_vm1 = vmmov 0   ;;  %v799_v50 = vmov 0.0  }
  0x10   :  { %v133_v34 = vld [vmem:[%s1141_s1 + $0x30] sm:$0xff]  ;;  %v134_v35 = vld [vmem:[%s1141_s1 + $0x38] sm:$0xff]  ;;  %v937_v36 = vld [vmem:[%s1140_s0 + $0x60] sm:$0xff]  ;;  %663 = vmatprep.mubr.msk.f32.mxu1 %vm798_vm1, %v799_v50  ;;  %628 = vmatprep.mubr.msk.f32.mxu0 %vm798_vm1, %v799_v50 }
  0x11   :  { %v65_v37 = vsel %vm28_vm0, %v937_v36, -inf  ;;  %v944_v38 = vld [vmem:[%s1140_s0 + $0x78] sm:$0xff]  ;;  %v951_v40 = vld [vmem:[%s1140_s0 + $0x70] sm:$0xff]  ;;  %v135_v42 = vld [vmem:[%s1141_s1 + $0x40] sm:$0xff] }
  0x12   :  { %v74_v39 = vsel %vm28_vm0, %v944_v38, -inf  ;;  %v71_v41 = vsel %vm28_vm0, %v951_v40, -inf  ;;  %v139_v43 = vld [vmem:[%s1141_s1 + $0x60] sm:$0xff]  ;;  %v136_v44 = vld [vmem:[%s1141_s1 + $0x48] sm:$0xff]  ;;  %v137_v45 = vld [vmem:[%s1141_s1 + $0x50] sm:$0xff] }
  0x13   :  { %54 = vmax.xlane.f32.xlu1 %v53_v19  ;;  %57 = vmax.xlane.f32.xlu0 %v56_v20  ;;  %v138_v46 = vld [vmem:[%s1141_s1 + $0x58] sm:$0xff]  ;;  %v140_v47 = vld [vmem:[%s1141_s1 + $0x68] sm:$0xff]  ;;  %v141_v48 = vld [vmem:[%s1141_s1 + $0x70] sm:$0xff]  ;;  %v125_v19 = vlaneseq }
  0x14   :  { %v142_v49 = vld [vmem:[%s1141_s1 + $0x78] sm:$0xff]  ;;  %vm1001_vm2 = vmpackc.low %vm28_vm0, %vm28_vm0  ;;  %s801_s1 = smov [#allocation2]  }
  0x15   :  { %s504_s16 = sshll.u32 %s801_s1, 4  ;;  %s505_s16 = int_to_ptr.vmem [resolvable:$true] %s504_s16 }
  0x16   :  { %s772_s17 = scalar_lea.vmem %s505_s16, 16  ;;  %s776_s18 = scalar_lea.vmem %s505_s16, 32 }
  0x17   :  { %60 = vmax.xlane.f32.xlu1 %v59_v23  ;;  %63 = vmax.xlane.f32.xlu0 %v62_v24  ;;  %p773_p0 = scmp.ne.s32.totalorder %s505_s16, %s772_s17  ;;  %p777_p1 = scmp.lt.s32.totalorder %s505_s16, %s505_s16 }
  0x18   :  { %p778_p2 = scmp.lt.s32.totalorder %s776_s18, %s772_s17 }
  0x1a   :  { %p779_p3 = por %p778_p2, %p777_p1 }
  0x1b   :  { %69 = vmax.xlane.f32.xlu1 %v68_v26 }
  0x1c   :  { %p780_p4 = pnand %p779_p3, %p773_p0 }
  0x2c   :  { %147 = vperm.xlu1 %737, %v128_v28   ;;  %v1016_v28 = vand.u32 127, %v125_v19 }
  0x2d   :  { %144 = vperm.xlu0 %736, %v127_v29  }
  0x30   :  { %150 = vperm.xlu1 %737, %v129_v30  }
  0x31   :  { %156 = vperm.xlu0 %736, %v131_v31  }
  0x34   :  { %153 = vperm.xlu1 %737, %v130_v32  }
  0x35   :  { %159 = vperm.xlu0 %736, %v132_v33  }
  0x38   :  { %162 = vperm.xlu1 %737, %v133_v34  }
  0x3c   :  { %165 = vperm.xlu1 %737, %v134_v35  }
  0x54   :  { %66 = vmax.xlane.f32.xlu0 %v65_v37 }
  0x58   :  { %75 = vmax.xlane.f32.xlu0 %v74_v39 }
  0x60   :  { %72 = vmax.xlane.f32.xlu1 %v71_v41 }
  0x6e   :  { %168 = vperm.xlu0 %736, %v135_v42  }
  0x71   :  { %180 = vperm.xlu1 %737, %v139_v43  }
  0x72   :  { %171 = vperm.xlu0 %736, %v136_v44  }
  0x76   :  { %174 = vperm.xlu0 %736, %v137_v45  }
  0x7a   :  { %177 = vperm.xlu0 %736, %v138_v46  }
  0x7e   :  { %183 = vperm.xlu0 %736, %v140_v47  }
  0x82   :  { %186 = vperm.xlu0 %736, %v141_v48  }
  0x86   :  { %189 = vperm.xlu0 %736, %v142_v49  }
  0x90   :  { %v37_v51 = vpop.xlane.xlu1 %36  ;;  %v31_v52 = vpop.xlane.xlu0 %30 }
  0x91   :  { %v77_v53 = vsub.f32 %v825_v1, %v31_v52  ;;  %v984_v58 = vsub.f32 %v820_v0, %v37_v51 }
  0x93   :  { %v93_v56 = vmul.f32 1.442695, %v77_v53  ;;  %v97_v63 = vmul.f32 1.442695, %v984_v58 }
  0x94   :  { %v40_v54 = vpop.xlane.xlu1 %39  ;;  %v34_v55 = vpop.xlane.xlu0 %33 }
  0x95   :  { %v78_v57 = vsub.f32 %v839_v5, %v34_v55  ;;  %v987_v60 = vsub.f32 %v830_v2, %v40_v54  ;;  %738 = vpow2.f32 %v93_v56 }
  0x97   :  { %v95_v59 = vmul.f32 1.442695, %v78_v57  ;;  %v99_v1 = vmul.f32 1.442695, %v987_v60 }
  0x98   :  { %v46_v61 = vpop.xlane.xlu1 %45  ;;  %v43_v62 = vpop.xlane.xlu0 %42 }
  0x99   :  { %740 = vpow2.f32 %v95_v59  ;;  %v992_v5 = vsub.f32 %v848_v9, %v46_v61  ;;  %v995_v0 = vsub.f32 %v853_v10, %v43_v62 }
  0x9a   :  { %742 = vpow2.f32 %v97_v63 }
  0x9b   :  { %744 = vpow2.f32 %v99_v1  ;;  %v103_v8 = vmul.f32 1.442695, %v992_v5  ;;  %v101_v12 = vmul.f32 1.442695, %v995_v0 }
  0x9c   :  { %v52_v3 = vpop.xlane.xlu1 %51  ;;  %v49_v4 = vpop.xlane.xlu0 %48 }
  0x9d   :  { %746 = vpow2.f32 %v103_v8  ;;  %v1006_v10 = vsub.f32 %v862_v13, %v52_v3  ;;  %v1011_v20 = vsub.f32 %v867_v14, %v49_v4 }
  0x9e   :  { %748 = vpow2.f32 %v101_v12 }
  0x9f   :  { %v739_v7 = vpop.eup %738  ;;  %v107_v30 = vmul.f32 1.442695, %v1006_v10  ;;  %v105_v13 = vmul.f32 1.442695, %v1011_v20 }
  0xa0   :  { %v55_v2 = vpop.xlane.xlu1 %54  ;;  %v58_v6 = vpop.xlane.xlu0 %57 }
  0xa1   :  { %v1023_v33 = vsub.f32 %v876_v17, %v55_v2  ;;  %750 = vpow2.f32 %v107_v30  ;;  %v1030_v41 = vsub.f32 %v881_v18, %v58_v6 }
  0xa2   :  { %752 = vpow2.f32 %v105_v13 }
  0xa3   :  { %v741_v11 = vpop.eup %740  ;;  %v109_v46 = vmul.f32 1.442695, %v1023_v33  ;;  %v111_v47 = vmul.f32 1.442695, %v1030_v41 }
  0xa4   :  { %v61_v15 = vpop.xlane.xlu1 %60  ;;  %v699_v9 = vpack.c.bf16 %v741_v11, %v739_v7  ;;  %v64_v23 = vpop.xlane.xlu0 %63 }
  0xa5   :  { %v743_v26 = vpop.eup %742  ;;  %754 = vpow2.f32 %v109_v46  ;;  %v1051_v56 = vsub.f32 %v895_v22, %v64_v23 }
  0xa6   :  { %701 = vmatpush3.bf16.xpose.msk.msra.mxu1 %vm1001_vm2, %v699_v9  ;;  %v745_v29 = vpop.eup %744  ;;  %756 = vpow2.f32 %v111_v47 }
  0xa7   :  { %702 = vmatprep.subr.bf16.mxu1 %v797_v27  ;;  %v703_v14 = vpack.c.bf16 %v745_v29, %v743_v26  ;;  %v747_v17 = vpop.eup %746  ;;  %v115_v62 = vmul.f32 1.442695, %v1051_v56 }
  0xa8   :  { %v1013_v24 = vpop.xlane.xlu1 %69  ;;  %v749_v45 = vpop.eup %748 }
  0xa9   :  { %v707_v51 = vpack.c.bf16 %v747_v17, %v749_v45 }
  0xab   :  { %v751_v59 = vpop.eup %750 }
  0xac   :  { %v148_v31 = vpop.permute.xlu1 %147  ;;  %v145_v32 = vpop.permute.xlu0 %144 }
  0xad   :  { %vm192_vm3 = vcmp.eq.s32.totalorder %v1016_v28, %v148_v31  ;;  %vm191_vm4 = vcmp.eq.s32.totalorder %v1016_v28, %v145_v32  ;;  %v753_v61 = vpop.eup %752 }
  0xae   :  { %v513_v34 = vsel %vm192_vm3, 1.0, %v799_v50  ;;  %v512_v35 = vsel %vm191_vm4, 1.0, %v799_v50  ;;  %705 = vmatpush3.bf16.xpose.msk.msra.mxu1 %vm1001_vm2, %v703_v14  ;;  %v711_v3 = vpack.c.bf16 %v751_v59, %v753_v61 }
  0xaf   :  { %v240_v37 = vmul.f32 %v513_v34, %v78_v57  ;;  %v239_v39 = vmul.f32 %v512_v35, %v77_v53  ;;  %706 = vmatprep.subr.bf16.mxu1 %v797_v27  ;;  %v1043_v53 = vsub.f32 %v890_v21, %v61_v15  ;;  %v755_v2 = vpop.eup %754 }
  0xb0   :  { %v151_v42 = vpop.permute.xlu1 %150  ;;  %v157_v43 = vpop.permute.xlu0 %156 }
  0xb1   :  { %vm193_vm5 = vcmp.eq.s32.totalorder %v1016_v28, %v151_v42  ;;  %v667_v44 = vpack.c.bf16 %v240_v37, %v239_v39  ;;  %vm195_vm8 = vcmp.eq.s32.totalorder %v1016_v28, %v157_v43  ;;  %v757_v7 = vpop.eup %756 }
  0xb2   :  { %v514_v48 = vsel %vm193_vm5, 1.0, %v799_v50  ;;  %v516_v22 = vsel %vm195_vm8, 1.0, %v799_v50  ;;  %v715_v11 = vpack.c.bf16 %v757_v7, %v755_v2 }
  0xb3   :  { %669 = vmatpush3.bf16.xpose.msk.msra.mxu0 %vm1001_vm2, %v667_v44  ;;  %v241_v54 = vmul.f32 %v514_v48, %v984_v58  ;;  %v243_v4 = vmul.f32 %v516_v22, %v995_v0 }
  0xb4   :  { %v154_v18 = vpop.permute.xlu1 %153  ;;  %v160_v49 = vpop.permute.xlu0 %159  ;;  %670 = vmatprep.subr.bf16.mxu0 %v797_v27 }
  0xb5   :  { %vm194_vm6 = vcmp.eq.s32.totalorder %v1016_v28, %v154_v18  ;;  %vm196_vm7 = vcmp.eq.s32.totalorder %v1016_v28, %v160_v49 }
  0xb6   :  { %v515_v52 = vsel %vm194_vm6, 1.0, %v799_v50  ;;  %709 = vmatpush3.bf16.xpose.msk.msra.mxu1 %vm1001_vm2, %v707_v51  ;;  %v517_v58 = vsel %vm196_vm7, 1.0, %v799_v50 }
  0xb7   :  { %v242_v55 = vmul.f32 %v515_v52, %v987_v60  ;;  %710 = vmatprep.subr.bf16.mxu1 %v797_v27  ;;  %v113_v60 = vmul.f32 1.442695, %v1043_v53  ;;  %v244_v1 = vmul.f32 %v517_v58, %v992_v5  ;;  %v800_v58 = vmov 1.0  }
  0xb8   :  { %v163_v57 = vpop.permute.xlu1 %162 }
  0xb9   :  { %v671_v21 = vpack.c.bf16 %v242_v55, %v241_v54  ;;  %758 = vpow2.f32 %v113_v60  ;;  %v675_v6 = vpack.c.bf16 %v244_v1, %v243_v4  ;;  %vm197_vm10 = vcmp.eq.s32.totalorder %v1016_v28, %v163_v57 }
  0xba   :  { %760 = vpow2.f32 %v115_v62  ;;  %v518_v5 = vsel %vm197_vm10, 1.0, %v799_v50 }
  0xbb   :  { %673 = vmatpush3.bf16.xpose.msk.msra.mxu0 %vm1001_vm2, %v671_v21  ;;  %v245_v12 = vmul.f32 %v518_v5, %v1011_v20 }
  0xbc   :  { %v166_v63 = vpop.permute.xlu1 %165  ;;  %674 = vmatprep.subr.bf16.mxu0 %v797_v27 }
  0xbd   :  { %vm198_vm9 = vcmp.eq.s32.totalorder %v1016_v28, %v166_v63 }
  0xbe   :  { %713 = vmatpush3.bf16.xpose.msk.msra.mxu1 %vm1001_vm2, %v711_v3  ;;  %v519_v8 = vsel %vm198_vm9, 1.0, %v799_v50 }
  0xbf   :  { %714 = vmatprep.subr.bf16.mxu1 %v797_v27  ;;  %v246_v0 = vmul.f32 %v519_v8, %v1006_v10  ;;  %v90_v10 = vsub.f32 %v904_v25, %v1013_v24 }
  0xc1   :  { %v679_v9 = vpack.c.bf16 %v246_v0, %v245_v12  ;;  %v119_v20 = vmul.f32 1.442695, %v90_v10 }
  0xc3   :  { %677 = vmatpush3.bf16.xpose.msk.msra.mxu0 %vm1001_vm2, %v675_v6  ;;  %v759_v15 = vpop.eup %758  ;;  %762 = vpow2.f32 %v119_v20 }
  0xc4   :  { %678 = vmatprep.subr.bf16.mxu0 %v797_v27  ;;  %v761_v19 = vpop.eup %760 }
  0xc5   :  { %v719_v23 = vpack.c.bf16 %v761_v19, %v759_v15 }
  0xc6   :  { %717 = vmatpush3.bf16.xpose.msk.msra.mxu1 %vm1001_vm2, %v715_v11 }
  0xc7   :  { %718 = vmatprep.subr.bf16.mxu1 %v797_v27 }
  0xcb   :  { %681 = vmatpush3.bf16.xpose.msk.msra.mxu0 %vm1001_vm2, %v679_v9 }
  0xcc   :  { %682 = vmatprep.subr.bf16.mxu0 %v797_v27 }
  0xcd   :  { %v763_v37 = vpop.eup %762 }
  0xce   :  { %721 = vmatpush3.bf16.xpose.msk.msra.mxu1 %vm1001_vm2, %v719_v23 }
  0xcf   :  { %722 = vmatprep.subr.bf16.mxu1 %v797_v27 }
  0xe1   :  { %v67_v26 = vpop.xlane.xlu0 %66 }
  0xe2   :  { %v89_v29 = vsub.f32 %v937_v36, %v67_v26 }
  0xe4   :  { %v117_v30 = vmul.f32 1.442695, %v89_v29 }
  0xe5   :  { %v76_v13 = vpop.xlane.xlu0 %75 }
  0xe6   :  { %764 = vpow2.f32 %v117_v30  ;;  %v92_v31 = vsub.f32 %v944_v38, %v76_v13 }
  0xe8   :  { %v123_v32 = vmul.f32 1.442695, %v92_v31 }
  0xea   :  { %766 = vpow2.f32 %v123_v32 }
  0xed   :  { %v73_v14 = vpop.xlane.xlu1 %72  ;;  %v169_v34 = vpop.permute.xlu0 %168 }
  0xee   :  { %v91_v35 = vsub.f32 %v951_v40, %v73_v14  ;;  %vm199_vm11 = vcmp.eq.s32.totalorder %v1016_v28, %v169_v34 }
  0xef   :  { %v520_v24 = vsel %vm199_vm11, 1.0, %v799_v50 }
  0xf0   :  { %v765_v39 = vpop.eup %764  ;;  %v121_v25 = vmul.f32 1.442695, %v91_v35  ;;  %v247_v40 = vmul.f32 %v520_v24, %v1023_v33 }
  0xf1   :  { %v172_v36 = vpop.permute.xlu0 %171  ;;  %v723_v42 = vpack.c.bf16 %v763_v37, %v765_v39  ;;  %v181_v33 = vpop.permute.xlu1 %180 }
  0xf2   :  { %768 = vpow2.f32 %v121_v25  ;;  %vm200_vm12 = vcmp.eq.s32.totalorder %v1016_v28, %v172_v36  ;;  %vm203_vm15 = vcmp.eq.s32.totalorder %v1016_v28, %v181_v33 }
  0xf3   :  { %v521_v38 = vsel %vm200_vm12, 1.0, %v799_v50  ;;  %725 = vmatpush3.bf16.xpose.msk.msra.mxu1 %vm1001_vm2, %v723_v42  ;;  %v524_v57 = vsel %vm203_vm15, 1.0, %v799_v50 }
  0xf4   :  { %v248_v43 = vmul.f32 %v521_v38, %v1030_v41  ;;  %726 = vmatprep.subr.bf16.mxu1 %v797_v27  ;;  %v767_v47 = vpop.eup %766  ;;  %v251_v59 = vmul.f32 %v524_v57, %v89_v29 }
  0xf5   :  { %v175_v17 = vpop.permute.xlu0 %174 }
  0xf6   :  { %v683_v44 = vpack.c.bf16 %v248_v43, %v247_v40  ;;  %vm201_vm13 = vcmp.eq.s32.totalorder %v1016_v28, %v175_v17 }
  0xf7   :  { %v522_v45 = vsel %vm201_vm13, 1.0, %v799_v50 }
  0xf8   :  { %685 = vmatpush3.bf16.xpose.msk.msra.mxu0 %vm1001_vm2, %v683_v44  ;;  %v249_v18 = vmul.f32 %v522_v45, %v1043_v53 }
  0xf9   :  { %v178_v46 = vpop.permute.xlu0 %177  ;;  %686 = vmatprep.subr.bf16.mxu0 %v797_v27 }
  0xfa   :  { %vm202_vm14 = vcmp.eq.s32.totalorder %v1016_v28, %v178_v46 }
  0xfb   :  { %v523_v41 = vsel %vm202_vm14, 1.0, %v799_v50 }
  0xfc   :  { %v769_v48 = vpop.eup %768  ;;  %v250_v49 = vmul.f32 %v523_v41, %v1051_v56 }
  0xfd   :  { %v184_v51 = vpop.permute.xlu0 %183  ;;  %v727_v52 = vpack.c.bf16 %v767_v47, %v769_v48 }
  0xfe   :  { %v687_v54 = vpack.c.bf16 %v250_v49, %v249_v18  ;;  %vm204_vm1 = vcmp.eq.s32.totalorder %v1016_v28, %v184_v51 }
  0xff   :  { %v525_v55 = vsel %vm204_vm1, 1.0, %v799_v50  ;;  %729 = vmatpush3.bf16.xpose.msk.msra.mxu1 %vm1001_vm2, %v727_v52 }
 0x100   :  { %689 = vmatpush3.bf16.xpose.msk.msra.mxu0 %vm1001_vm2, %v687_v54  ;;  %v252_v56 = vmul.f32 %v525_v55, %v90_v10 }
 0x101   :  { %v187_v53 = vpop.permute.xlu0 %186  ;;  %690 = vmatprep.subr.bf16.mxu0 %v797_v27 }
 0x102   :  { %v691_v61 = vpack.c.bf16 %v252_v56, %v251_v59  ;;  %vm205_vm3 = vcmp.eq.s32.totalorder %v1016_v28, %v187_v53 }
 0x103   :  { %v526_v62 = vsel %vm205_vm3, 1.0, %v799_v50 }
 0x104   :  { %v253_v63 = vmul.f32 %v526_v62, %v91_v35 }
 0x105   :  { %v190_v21 = vpop.permute.xlu0 %189 }
 0x106   :  { %vm206_vm4 = vcmp.eq.s32.totalorder %v1016_v28, %v190_v21  ;;  %664 = vmatmul.mubr.msk.f32.vlgmr.msra.gmra.mrb[0].mxu1 %vm28_vm0, %v800_v58 }
 0x107   :  { %v527_v60 = vsel %vm206_vm4, 1.0, %v799_v50 }
 0x108   :  { %693 = vmatpush3.bf16.xpose.msk.msra.mxu0 %vm1001_vm2, %v691_v61  ;;  %v254_v22 = vmul.f32 %v527_v60, %v92_v31 }
 0x109   :  { %694 = vmatprep.subr.bf16.mxu0 %v797_v27 }
 0x10a   :  { %v695_v1 = vpack.c.bf16 %v254_v22, %v253_v63 }
 0x110   :  { %697 = vmatpush3.bf16.xpose.msk.msra.mxu0 %vm1001_vm2, %v695_v1 }
 0x117   :  { %629 = vmatmul.mubr.msk.f32.vlgmr.msra.gmra.mrb[0].mxu0 %vm28_vm0, %v800_v58 }
 0x1d9   :  { %v490_v28 = vpop.f32.mrb[0].mxu1 }
 0x1da   :  { %770 = vlog2.f32 %v490_v28  ;;  %v665_v3 = vpop.f32.mrb[1].mxu1 }
 0x1e4   :  { %v771_v4 = vpop.eup %770 }
 0x1e5   :  { %v495_v2 = vmul.f32 0.6931472, %v771_v4 }
 0x1ea   :  { %v372_v6 = vpop.f32.mrb[0].mxu0 }
 0x1eb   :  { %v496_v7 = vsub.f32 %v372_v6, %v495_v2  ;;  %v630_v50 = vpop.f32.mrb[1].mxu0 }
 0x1ed   :  { %497 = vst [vmem:[#allocation2] sm:$0x1] %v496_v7 }
 0x1ee   :  { %783 = shalt.err (!%p780_p4)
}
 0x1ef   :  { %s784_s21 = scalar_lea.hbm %s1142_s2, 16 }
 0x1f0   :  { %p785_p5 = scmp.ne.s32.totalorder %s1142_s2, %s784_s21  ;;  %p788_p6 = scmp.lt.u32.totalorder %s784_s21, %s1142_s2 }
 0x1f2   :  { %p790_p7 = pnand %p788_p6, %p785_p5 }
 0x1f4   :  { %793 = shalt.err (!%p790_p7)
}
 0x1f5   :  { %507 = dma.vmem_to_hbm [thread:$0]  %s505_s16, 16, %s1142_s2, [#allocation3]  }
 0x1f6   :  { %794 = dma.done.wait [#allocation3], 16  }
 0x1f7   :  { %795 = vsyncadd [#allocation3], 4294967280 }
 0x1f8   :  { %511 = vsyncpa [#allocation3], 1 }

</bundles_post_ra>
